<compile_context>
chip_gen: v7x
topology: tpu7x:2x2x1
jax: 0.10.0
libtpu: 0.0.40
codegen_flags: <defaults>
</compile_context>

<pallas_src>
import functools

import jax
import jax.numpy as jnp
from jax.experimental import pallas as pl
from jax.experimental.pallas import tpu as pltpu

# Neighbour order of the PyTorch reference (first offset -> MSB).
_OFFSETS = tuple((u, v) for v in range(3) for u in range(3)
                 if not (u == 1 and v == 1))


def _census_kernel(x_ref, o_ref, *, plane_w, num_packed):
    """x_ref: (P, H, G*W) block -> o_ref: (P, H, G*W) float32 census/255.

    Each of the `num_packed` planes occupies `plane_w` consecutive lanes.
    Wrap-around rolls only corrupt each plane's 1-pixel border, which the
    reflect fix-up overwrites with interior values (matching the torch
    reference's crop + reflect-pad).
    """
    x = x_ref[...].astype(jnp.float32)                  # (P, H, GW)
    h = x.shape[1]

    # Row-shifted copies (2 sublane rolls) shared across the 3 column offsets.
    # rolled[i] = x[i + (v - 1)]  <=>  shift = 1 - v.
    x_rows = (jnp.roll(x, 1, axis=1), x, jnp.roll(x, -1, axis=1))

    # Census as a float weighted sum, MSB first (same order as the reference).
    acc = jnp.zeros(x.shape, jnp.float32)
    bit = 0
    for v in range(3):
        xr = x_rows[v]
        for u in range(3):
            if u == 1 and v == 1:
                continue
            nb = xr if u == 1 else jnp.roll(xr, 1 - u, axis=2)
            wk = jnp.float32(1 << (7 - bit))            # exact power of two
            acc = acc + jnp.where(nb >= x, wk, jnp.float32(0.0))
            bit += 1
    c = acc * jnp.float32(1.0 / 255.0)

    # Reflect fix-up, rows first then columns (also fixes the corners):
    #   out[0,:] = census[2,:]   out[h-1,:] = census[h-3,:]
    #   out[:,0] = census[:,2]   out[:,w-1] = census[:,w-3]   (per packed plane)
    row_idx = jax.lax.broadcasted_iota(jnp.int32, c.shape, 1)
    c = jnp.where(row_idx == 0, jnp.roll(c, -2, axis=1), c)
    c = jnp.where(row_idx == h - 1, jnp.roll(c, 2, axis=1), c)

    col_idx = jax.lax.broadcasted_iota(jnp.int32, c.shape, 2)
    if num_packed > 1 and (plane_w & (plane_w - 1)) == 0:
        local = jnp.bitwise_and(col_idx, plane_w - 1)   # column within plane
        left = local == 0
        right = local == plane_w - 1
    else:
        left = col_idx == 0
        right = col_idx == plane_w - 1
        for gi in range(1, num_packed):
            left = left | (col_idx == gi * plane_w)
            right = right | (col_idx == gi * plane_w + plane_w - 1)
    c = jnp.where(left, jnp.roll(c, -2, axis=2), c)
    c = jnp.where(right, jnp.roll(c, 2, axis=2), c)

    o_ref[...] = c


def _largest_divisor_at_most(n, cap):
    cap = max(1, min(n, cap))
    for d in range(cap, 0, -1):
        if n % d == 0:
            return d
    return 1


def census_transform_pallas(img, kernel_size=3, *,
                            lane_target=128, block_bytes_cap=2 << 20):
    """img: (N, C, H, W) -> (N, C, H, W) float32 census transform / 255."""
    if kernel_size != 3:
        raise NotImplementedError
    assert img.ndim == 4
    n, c, h, w = img.shape
    assert h >= 4 and w >= 4, "reflect pad of the (H-2, W-2) census needs H, W >= 4"
    nc = n * c
    x = img.reshape(nc, h, w)                           # metadata-only reshape

    # Lane packing: G planes side-by-side along the last dim when W < 128.
    g = 1 if w >= lane_target else _largest_divisor_at_most(nc, lane_target // w)
    groups = nc // g
    gw = g * w
    if g > 1:
        x = x.reshape(groups, g, h, w).transpose(0, 2, 1, 3).reshape(groups, h, gw)

    # Batch P packed groups per grid step; keep the block well inside VMEM and
    # keep >= 2 grid steps when possible (megacore on v7x).
    plane_bytes = h * gw * 4
    max_p = max(1, block_bytes_cap // plane_bytes)
    p_cap = groups if groups == 1 else max(1, min(max_p, groups // 2))
    p = _largest_divisor_at_most(groups, p_cap)
    grid = (groups // p,)

    in_bytes = p * h * gw * x.dtype.itemsize
    out_bytes = p * h * gw * 4
    vmem_need = 2 * (in_bytes + out_bytes) + (2 << 20)  # double-buffered + slack
    cp_kwargs = dict(dimension_semantics=("parallel",))
    if vmem_need > (32 << 20):
        # TODO(synk): planes too large for VMEM (notably v7x's 64 MiB) should be
        # tiled along H with an explicit 2-row halo instead of raising the limit.
        cp_kwargs["vmem_limit_bytes"] = int(min(vmem_need, 100 << 20))

    kernel = functools.partial(_census_kernel, plane_w=w, num_packed=g)
    out = pl.pallas_call(
        kernel,
        out_shape=jax.ShapeDtypeStruct((groups, h, gw), jnp.float32),
        grid=grid,
        in_specs=[pl.BlockSpec((p, h, gw), lambda i: (i, 0, 0))],
        out_specs=pl.BlockSpec((p, h, gw), lambda i: (i, 0, 0)),
        compiler_params=pltpu.CompilerParams(**cp_kwargs),
    )(x)

    if g > 1:
        out = out.reshape(groups, h, g, w).transpose(0, 2, 1, 3).reshape(nc, h, w)
    return out.reshape(n, c, h, w)


def census_transform_ref(img, kernel_size=3):
    """Pure-JAX port of the torch reference (validation only)."""
    if kernel_size != 3:
        raise NotImplementedError
    n, c, h, w = img.shape
    cp = img[:, :, 1:h - 1, 1:w - 1]
    census = jnp.zeros((n, c, h - 2, w - 2), dtype=jnp.int32)
    for u, v in _OFFSETS:
        census = census * 2 + (img[:, :, v:v + h - 2, u:u + w - 2] >= cp
                               ).astype(jnp.int32)
    census = census.astype(jnp.float32) / 255.0
    return jnp.pad(census, ((0, 0), (0, 0), (1, 1), (1, 1)), mode="reflect")


if __name__ == "__main__":
    key = jax.random.PRNGKey(0)
    k1, k2 = jax.random.split(key)

    # Main case: 2x4 planes of 16x16 -> 8 planes packed to one lane-dense
    # (16, 128) block, reflect fix-up fused in-kernel.
    x1 = jax.random.normal(k1, (2, 4, 16, 16), dtype=jnp.float32)
    out1 = jax.block_until_ready(census_transform_pallas(x1))
    ref1 = census_transform_ref(x1)
    assert out1.shape == (2, 4, 16, 16), out1.shape
    assert out1.dtype == jnp.float32, out1.dtype
    assert bool(jnp.allclose(out1, ref1, atol=1e-6)), "mismatch (2,4,16,16)"

    # Non-power-of-two width / odd height exercises the generic packing path.
    x2 = jax.random.normal(k2, (1, 3, 10, 20), dtype=jnp.float32)
    out2 = jax.block_until_ready(census_transform_pallas(x2))
    ref2 = census_transform_ref(x2)
    assert out2.shape == (1, 3, 10, 20), out2.shape
    assert out2.dtype == jnp.float32, out2.dtype
    assert bool(jnp.allclose(out2, ref2, atol=1e-6)), "mismatch (1,3,10,20)"

    print("KERNEL_OK")
</pallas_src>

<mosaic_0001>
module attributes {stable_mosaic.version = 11 : i64} {
  func.func @_census_kernel(%arg0: i32, %arg1: memref<1x16x128xf32, #tpu.memory_space<vmem>>, %arg2: memref<1x16x128xf32, #tpu.memory_space<vmem>>) attributes {dimension_semantics = [#tpu.dimension_semantics<parallel>], iteration_bounds = array<i64: 1>, scalar_prefetch = 0 : i64, scratch_operands = 0 : i64, tpu.core_type = #tpu.core_type<tc>, window_params = [{transform_indices = @transform_0, window_bounds = array<i64: 1, 16, 128>}, {transform_indices = @transform_1, window_bounds = array<i64: 1, 16, 128>}]} {
    %c0 = arith.constant 0 : index
    %c0_0 = arith.constant 0 : index
    %c0_1 = arith.constant 0 : index
    %0 = vector.load %arg1[%c0, %c0_0, %c0_1] : memref<1x16x128xf32, #tpu.memory_space<vmem>>, vector<1x16x128xf32>
    %1 = vector.extract_strided_slice %0 {offsets = [0, 15, 0], sizes = [1, 1, 128], strides = [1, 1, 1]} : vector<1x16x128xf32> to vector<1x1x128xf32>
    %2 = vector.extract_strided_slice %0 {offsets = [0, 0, 0], sizes = [1, 15, 128], strides = [1, 1, 1]} : vector<1x16x128xf32> to vector<1x15x128xf32>
    %3 = tpu.concatenate %1, %2 in 1 : vector<1x1x128xf32>, vector<1x15x128xf32> -> vector<1x16x128xf32>
    %4 = vector.extract_strided_slice %0 {offsets = [0, 1, 0], sizes = [1, 15, 128], strides = [1, 1, 1]} : vector<1x16x128xf32> to vector<1x15x128xf32>
    %5 = vector.extract_strided_slice %0 {offsets = [0, 0, 0], sizes = [1, 1, 128], strides = [1, 1, 1]} : vector<1x16x128xf32> to vector<1x1x128xf32>
    %6 = tpu.concatenate %4, %5 in 1 : vector<1x15x128xf32>, vector<1x1x128xf32> -> vector<1x16x128xf32>
    %cst = arith.constant 0.000000e+00 : f32
    %7 = vector.broadcast %cst : f32 to vector<1x16x128xf32>
    %8 = vector.extract_strided_slice %3 {offsets = [0, 0, 127], sizes = [1, 16, 1], strides = [1, 1, 1]} : vector<1x16x128xf32> to vector<1x16x1xf32>
    %9 = vector.extract_strided_slice %3 {offsets = [0, 0, 0], sizes = [1, 16, 127], strides = [1, 1, 1]} : vector<1x16x128xf32> to vector<1x16x127xf32>
    %10 = tpu.concatenate %8, %9 in 2 : vector<1x16x1xf32>, vector<1x16x127xf32> -> vector<1x16x128xf32>
    %11 = arith.cmpf oge, %10, %0 : vector<1x16x128xf32>
    %cst_2 = arith.constant 1.280000e+02 : f32
    %cst_3 = arith.constant 0.000000e+00 : f32
    %12 = vector.broadcast %cst_2 : f32 to vector<1x16x128xf32>
    %13 = vector.broadcast %cst_3 : f32 to vector<1x16x128xf32>
    %14 = arith.select %11, %12, %13 : vector<1x16x128xi1>, vector<1x16x128xf32>
    %15 = arith.addf %7, %14 : vector<1x16x128xf32>
    %16 = arith.cmpf oge, %3, %0 : vector<1x16x128xf32>
    %cst_4 = arith.constant 6.400000e+01 : f32
    %cst_5 = arith.constant 0.000000e+00 : f32
    %17 = vector.broadcast %cst_4 : f32 to vector<1x16x128xf32>
    %18 = vector.broadcast %cst_5 : f32 to vector<1x16x128xf32>
    %19 = arith.select %16, %17, %18 : vector<1x16x128xi1>, vector<1x16x128xf32>
    %20 = arith.addf %15, %19 : vector<1x16x128xf32>
    %21 = vector.extract_strided_slice %3 {offsets = [0, 0, 1], sizes = [1, 16, 127], strides = [1, 1, 1]} : vector<1x16x128xf32> to vector<1x16x127xf32>
    %22 = vector.extract_strided_slice %3 {offsets = [0, 0, 0], sizes = [1, 16, 1], strides = [1, 1, 1]} : vector<1x16x128xf32> to vector<1x16x1xf32>
    %23 = tpu.concatenate %21, %22 in 2 : vector<1x16x127xf32>, vector<1x16x1xf32> -> vector<1x16x128xf32>
    %24 = arith.cmpf oge, %23, %0 : vector<1x16x128xf32>
    %cst_6 = arith.constant 3.200000e+01 : f32
    %cst_7 = arith.constant 0.000000e+00 : f32
    %25 = vector.broadcast %cst_6 : f32 to vector<1x16x128xf32>
    %26 = vector.broadcast %cst_7 : f32 to vector<1x16x128xf32>
    %27 = arith.select %24, %25, %26 : vector<1x16x128xi1>, vector<1x16x128xf32>
    %28 = arith.addf %20, %27 : vector<1x16x128xf32>
    %29 = vector.extract_strided_slice %0 {offsets = [0, 0, 127], sizes = [1, 16, 1], strides = [1, 1, 1]} : vector<1x16x128xf32> to vector<1x16x1xf32>
    %30 = vector.extract_strided_slice %0 {offsets = [0, 0, 0], sizes = [1, 16, 127], strides = [1, 1, 1]} : vector<1x16x128xf32> to vector<1x16x127xf32>
    %31 = tpu.concatenate %29, %30 in 2 : vector<1x16x1xf32>, vector<1x16x127xf32> -> vector<1x16x128xf32>
    %32 = arith.cmpf oge, %31, %0 : vector<1x16x128xf32>
    %cst_8 = arith.constant 1.600000e+01 : f32
    %cst_9 = arith.constant 0.000000e+00 : f32
    %33 = vector.broadcast %cst_8 : f32 to vector<1x16x128xf32>
    %34 = vector.broadcast %cst_9 : f32 to vector<1x16x128xf32>
    %35 = arith.select %32, %33, %34 : vector<1x16x128xi1>, vector<1x16x128xf32>
    %36 = arith.addf %28, %35 : vector<1x16x128xf32>
    %37 = vector.extract_strided_slice %0 {offsets = [0, 0, 1], sizes = [1, 16, 127], strides = [1, 1, 1]} : vector<1x16x128xf32> to vector<1x16x127xf32>
    %38 = vector.extract_strided_slice %0 {offsets = [0, 0, 0], sizes = [1, 16, 1], strides = [1, 1, 1]} : vector<1x16x128xf32> to vector<1x16x1xf32>
    %39 = tpu.concatenate %37, %38 in 2 : vector<1x16x127xf32>, vector<1x16x1xf32> -> vector<1x16x128xf32>
    %40 = arith.cmpf oge, %39, %0 : vector<1x16x128xf32>
    %cst_10 = arith.constant 8.000000e+00 : f32
    %cst_11 = arith.constant 0.000000e+00 : f32
    %41 = vector.broadcast %cst_10 : f32 to vector<1x16x128xf32>
    %42 = vector.broadcast %cst_11 : f32 to vector<1x16x128xf32>
    %43 = arith.select %40, %41, %42 : vector<1x16x128xi1>, vector<1x16x128xf32>
    %44 = arith.addf %36, %43 : vector<1x16x128xf32>
    %45 = vector.extract_strided_slice %6 {offsets = [0, 0, 127], sizes = [1, 16, 1], strides = [1, 1, 1]} : vector<1x16x128xf32> to vector<1x16x1xf32>
    %46 = vector.extract_strided_slice %6 {offsets = [0, 0, 0], sizes = [1, 16, 127], strides = [1, 1, 1]} : vector<1x16x128xf32> to vector<1x16x127xf32>
    %47 = tpu.concatenate %45, %46 in 2 : vector<1x16x1xf32>, vector<1x16x127xf32> -> vector<1x16x128xf32>
    %48 = arith.cmpf oge, %47, %0 : vector<1x16x128xf32>
    %cst_12 = arith.constant 4.000000e+00 : f32
    %cst_13 = arith.constant 0.000000e+00 : f32
    %49 = vector.broadcast %cst_12 : f32 to vector<1x16x128xf32>
    %50 = vector.broadcast %cst_13 : f32 to vector<1x16x128xf32>
    %51 = arith.select %48, %49, %50 : vector<1x16x128xi1>, vector<1x16x128xf32>
    %52 = arith.addf %44, %51 : vector<1x16x128xf32>
    %53 = arith.cmpf oge, %6, %0 : vector<1x16x128xf32>
    %cst_14 = arith.constant 2.000000e+00 : f32
    %cst_15 = arith.constant 0.000000e+00 : f32
    %54 = vector.broadcast %cst_14 : f32 to vector<1x16x128xf32>
    %55 = vector.broadcast %cst_15 : f32 to vector<1x16x128xf32>
    %56 = arith.select %53, %54, %55 : vector<1x16x128xi1>, vector<1x16x128xf32>
    %57 = arith.addf %52, %56 : vector<1x16x128xf32>
    %58 = vector.extract_strided_slice %6 {offsets = [0, 0, 1], sizes = [1, 16, 127], strides = [1, 1, 1]} : vector<1x16x128xf32> to vector<1x16x127xf32>
    %59 = vector.extract_strided_slice %6 {offsets = [0, 0, 0], sizes = [1, 16, 1], strides = [1, 1, 1]} : vector<1x16x128xf32> to vector<1x16x1xf32>
    %60 = tpu.concatenate %58, %59 in 2 : vector<1x16x127xf32>, vector<1x16x1xf32> -> vector<1x16x128xf32>
    %61 = arith.cmpf oge, %60, %0 : vector<1x16x128xf32>
    %cst_16 = arith.constant 1.000000e+00 : f32
    %cst_17 = arith.constant 0.000000e+00 : f32
    %62 = vector.broadcast %cst_16 : f32 to vector<1x16x128xf32>
    %63 = vector.broadcast %cst_17 : f32 to vector<1x16x128xf32>
    %64 = arith.select %61, %62, %63 : vector<1x16x128xi1>, vector<1x16x128xf32>
    %65 = arith.addf %57, %64 : vector<1x16x128xf32>
    %cst_18 = arith.constant 0.00392156886 : f32
    %66 = vector.broadcast %cst_18 : f32 to vector<1x16x128xf32>
    %67 = arith.mulf %65, %66 : vector<1x16x128xf32>
    %68 = tpu.iota {dimensions = array<i32: 1>} : vector<1x16x128xi32>
    %c0_i32 = arith.constant 0 : i32
    %69 = vector.broadcast %c0_i32 : i32 to vector<1x16x128xi32>
    %70 = arith.cmpi eq, %68, %69 : vector<1x16x128xi32>
    %71 = vector.extract_strided_slice %67 {offsets = [0, 2, 0], sizes = [1, 14, 128], strides = [1, 1, 1]} : vector<1x16x128xf32> to vector<1x14x128xf32>
    %72 = vector.extract_strided_slice %67 {offsets = [0, 0, 0], sizes = [1, 2, 128], strides = [1, 1, 1]} : vector<1x16x128xf32> to vector<1x2x128xf32>
    %73 = tpu.concatenate %71, %72 in 1 : vector<1x14x128xf32>, vector<1x2x128xf32> -> vector<1x16x128xf32>
    %74 = arith.select %70, %73, %67 : vector<1x16x128xi1>, vector<1x16x128xf32>
    %c15_i32 = arith.constant 15 : i32
    %75 = vector.broadcast %c15_i32 : i32 to vector<1x16x128xi32>
    %76 = arith.cmpi eq, %68, %75 : vector<1x16x128xi32>
    %77 = vector.extract_strided_slice %74 {offsets = [0, 14, 0], sizes = [1, 2, 128], strides = [1, 1, 1]} : vector<1x16x128xf32> to vector<1x2x128xf32>
    %78 = vector.extract_strided_slice %74 {offsets = [0, 0, 0], sizes = [1, 14, 128], strides = [1, 1, 1]} : vector<1x16x128xf32> to vector<1x14x128xf32>
    %79 = tpu.concatenate %77, %78 in 1 : vector<1x2x128xf32>, vector<1x14x128xf32> -> vector<1x16x128xf32>
    %80 = arith.select %76, %79, %74 : vector<1x16x128xi1>, vector<1x16x128xf32>
    %81 = tpu.iota {dimensions = array<i32: 2>} : vector<1x16x128xi32>
    %c15_i32_19 = arith.constant 15 : i32
    %82 = vector.broadcast %c15_i32_19 : i32 to vector<1x16x128xi32>
    %83 = arith.andi %81, %82 : vector<1x16x128xi32>
    %c0_i32_20 = arith.constant 0 : i32
    %84 = vector.broadcast %c0_i32_20 : i32 to vector<1x16x128xi32>
    %85 = arith.cmpi eq, %83, %84 : vector<1x16x128xi32>
    %c15_i32_21 = arith.constant 15 : i32
    %86 = vector.broadcast %c15_i32_21 : i32 to vector<1x16x128xi32>
    %87 = arith.cmpi eq, %83, %86 : vector<1x16x128xi32>
    %88 = vector.extract_strided_slice %80 {offsets = [0, 0, 2], sizes = [1, 16, 126], strides = [1, 1, 1]} : vector<1x16x128xf32> to vector<1x16x126xf32>
    %89 = vector.extract_strided_slice %80 {offsets = [0, 0, 0], sizes = [1, 16, 2], strides = [1, 1, 1]} : vector<1x16x128xf32> to vector<1x16x2xf32>
    %90 = tpu.concatenate %88, %89 in 2 : vector<1x16x126xf32>, vector<1x16x2xf32> -> vector<1x16x128xf32>
    %91 = arith.select %85, %90, %80 : vector<1x16x128xi1>, vector<1x16x128xf32>
    %92 = vector.extract_strided_slice %91 {offsets = [0, 0, 126], sizes = [1, 16, 2], strides = [1, 1, 1]} : vector<1x16x128xf32> to vector<1x16x2xf32>
    %93 = vector.extract_strided_slice %91 {offsets = [0, 0, 0], sizes = [1, 16, 126], strides = [1, 1, 1]} : vector<1x16x128xf32> to vector<1x16x126xf32>
    %94 = tpu.concatenate %92, %93 in 2 : vector<1x16x2xf32>, vector<1x16x126xf32> -> vector<1x16x128xf32>
    %95 = arith.select %87, %94, %91 : vector<1x16x128xi1>, vector<1x16x128xf32>
    %c0_22 = arith.constant 0 : index
    %c0_23 = arith.constant 0 : index
    %c0_24 = arith.constant 0 : index
    %96 = vector.load %arg2[%c0_22, %c0_23, %c0_24] : memref<1x16x128xf32, #tpu.memory_space<vmem>>, vector<1x16x128xf32>
    tpu.vector_store %arg2[%c0_22, %c0_23, %c0_24], %95 {strides = array<i32>} : memref<1x16x128xf32, #tpu.memory_space<vmem>>, vector<1x16x128xf32>,
    return
  }
  func.func @transform_0(%arg0: i32) -> (i32, i32, i32) {
    %c0_i32 = arith.constant 0 : i32
    %c0_i32_0 = arith.constant 0 : i32
    %c0_i32_1 = arith.constant 0 : i32
    return %arg0, %c0_i32, %c0_i32_0 : i32, i32, i32
  }
  func.func @transform_1(%arg0: i32) -> (i32, i32, i32) {
    %c0_i32 = arith.constant 0 : i32
    %c0_i32_0 = arith.constant 0 : i32
    %c0_i32_1 = arith.constant 0 : i32
    return %arg0, %c0_i32, %c0_i32_0 : i32, i32, i32
  }
}

</mosaic_0001>

<bundles_post_ra>
// kernel: tpu_custom_call.1
= control target key start
LH: loop header
LB: loop body
LE: loop exit
PB: predicated region body
PF: predicated region fallthrough
CT: control target
= control target key end

     0   :  { %6 = vsyncpa [#allocation3], 0  ;;  %s340_s0 = inlined_call_operand.hbm [shape: f32[1,16,128], index: 0, kind: input, shape index: {}]   ;;  %s341_s1 = inlined_call_operand.hbm [shape: f32[1,16,128], index: 1, kind: output, shape index: {}]  }
   0x1   :  { %7 = vsyncpa [#allocation4], 0  ;;  %s263_s6 = smov [#allocation2]   ;;  %s215_s10 = scalar_lea.hbm %s340_s0, 256 }
   0x2   :  { %s13_s7 = sshll.u32 %s263_s6, 4  ;;  %p216_p0 = scmp.ne.s32.totalorder %s340_s0, %s215_s10  ;;  %s14_s7 = int_to_ptr.vmem [resolvable:$true] %s13_s7 }
   0x3   :  { %p219_p1 = scmp.lt.u32.totalorder %s215_s10, %s340_s0 }
   0x5   :  { %p221_p2 = pnand %p219_p1, %p216_p0 }
   0x7   :  { %224 = shalt.err (!%p221_p2)
}
   0x8   :  { %s225_s15 = scalar_lea.vmem %s14_s7, 256  ;;  %p230_p4 = scmp.lt.s32.totalorder %s14_s7, %s14_s7 }
   0x9   :  { %p226_p3 = scmp.ne.s32.totalorder %s14_s7, %s225_s15  ;;  %p231_p5 = scmp.lt.s32.totalorder %s225_s15, %s225_s15 }
   0xb   :  { %p232_p6 = por %p231_p5, %p230_p4 }
   0xd   :  { %p233_p7 = pnand %p232_p6, %p226_p3 }
   0xf   :  { %236 = shalt.err (!%p233_p7)
}
  0x10   :  { %s264_s16 = smov 128   ;;  %s265_s17 = smov 8  }
  0x11   :  { %19 = dma.hbm_to_vmem [thread:$0]  %s340_s0, 256, %s14_s7, [#allocation3], %s264_s16, %s264_s16, %s265_s17  }
  0x12   :  { %259 = dma.done.wait [#allocation3], 256  }
  0x13   :  { %260 = vsyncadd [#allocation3], 4294967040  ;;  %v297_v0 = vld [vmem:[#allocation2 + $0x8] sm:$0xff]  ;;  %v299_v1 = vld [vmem:[#allocation2] sm:$0xff]  ;;  %vm29_vm0 = vcmask 1040384   ;;  %s266_s20 = smov 1   ;;  %v131_v45 = vlaneseq }
  0x14   :  { %76 = vrot.lane.b32.xlu1 %v297_v0, %s266_s20  ;;  %74 = vrot.lane.b32.xlu0 %v299_v1, %s266_s20  ;;  %v26_v2 = vrot.slane %v297_v0, 7  ;;  %v30_v3 = vrot.slane %v299_v1, 7  ;;  %s267_s21 = smov 127   ;;  %v36_v6 = vrot.slane %v299_v1, 1  ;;  %v37_v7 = vrot.slane %v297_v0, 1  ;;  %s269_s0 = smov 126  }
  0x15   :  { %vm35_vm1 = vcmask 1046528   ;;  %v268_v14 = vmov 0.0   ;;  %v132_v54 = vshrl.u32 %v131_v45, 7  ;;  %s270_s22 = smov 2   ;;  %s271_s23 = smov [#allocation5]  }
  0x16   :  { %v34_v4 = vsel %vm29_vm0, %v26_v2, %v30_v3  ;;  %v31_v5 = vsel %vm29_vm0, %v30_v3, %v26_v2  ;;  %v42_v8 = vsel %vm35_vm1, %v37_v7, %v36_v6  ;;  %v38_v9 = vsel %vm35_vm1, %v36_v6, %v37_v7  ;;  %s194_s24 = sshll.u32 %s271_s23, 4  ;;  %s195_s24 = int_to_ptr.vmem [resolvable:$true] %s194_s24 }
  0x17   :  { %vm56_vm2 = vcmp.ge.f32.partialorder %v34_v4, %v299_v1  ;;  %vm57_vm3 = vcmp.ge.f32.partialorder %v31_v5, %v297_v0  ;;  %vm112_vm12 = vcmp.ge.f32.partialorder %v42_v8, %v297_v0  ;;  %vm111_vm13 = vcmp.ge.f32.partialorder %v38_v9, %v299_v1  ;;  %s237_s25 = scalar_lea.vmem %s195_s24, 256  ;;  %p242_p9 = scmp.lt.s32.totalorder %s195_s24, %s195_s24 }
  0x18   :  { %62 = vrot.lane.b32.xlu1 %v34_v4, %s267_s21  ;;  %44 = vrot.lane.b32.xlu0 %v34_v4, %s266_s20  ;;  %v58_v15 = vsel %vm56_vm2, 64.0, %v268_v14  ;;  %v59_v20 = vsel %vm57_vm3, 64.0, %v268_v14  ;;  %v114_v39 = vsel %vm112_vm12, 2.0, %v268_v14  ;;  %v113_v40 = vsel %vm111_vm13, 2.0, %v268_v14  ;;  %p238_p8 = scmp.ne.s32.totalorder %s195_s24, %s237_s25  ;;  %p243_p10 = scmp.lt.s32.totalorder %s237_s25, %s237_s25 }
  0x19   :  { %vm138_vm2 = vcmask 1045504   ;;  %vm134_vm3 = vcmp.eq.s32.totalorder %v132_v54, 0  ;;  %v133_v59 = vadd.s32 8, %v132_v54  ;;  %v163_v2 = vand.u32 127, %v131_v45 }
  0x1a   :  { %p244_p11 = por %p243_p10, %p242_p9 }
  0x1b   :  { %v164_v3 = vand.u32 15, %v163_v2 }
  0x1c   :  { %64 = vrot.lane.b32.xlu1 %v31_v5, %s267_s21  ;;  %46 = vrot.lane.b32.xlu0 %v31_v5, %s266_s20  ;;  %p245_p12 = pnand %p244_p11, %p238_p8 }
  0x20   :  { %88 = vrot.lane.b32.xlu1 %v297_v0, %s267_s21  ;;  %86 = vrot.lane.b32.xlu0 %v299_v1, %s267_s21 }
  0x24   :  { %101 = vrot.lane.b32.xlu1 %v42_v8, %s266_s20  ;;  %99 = vrot.lane.b32.xlu0 %v38_v9, %s266_s20 }
  0x28   :  { %119 = vrot.lane.b32.xlu1 %v42_v8, %s267_s21  ;;  %117 = vrot.lane.b32.xlu0 %v38_v9, %s267_s21 }
  0x86   :  { %v77_v10 = vpop.permute.xlu1 %76  ;;  %v75_v11 = vpop.permute.xlu0 %74 }
  0x87   :  { %vm81_vm8 = vcmp.ge.f32.partialorder %v77_v10, %v297_v0  ;;  %vm80_vm9 = vcmp.ge.f32.partialorder %v75_v11, %v299_v1 }
  0x88   :  { %v83_v29 = vsel %vm81_vm8, 16.0, %v268_v14  ;;  %v82_v30 = vsel %vm80_vm9, 16.0, %v268_v14 }
  0x8a   :  { %v63_v12 = vpop.permute.xlu1 %62  ;;  %v45_v13 = vpop.permute.xlu0 %44 }
  0x8b   :  { %vm50_vm4 = vcmp.ge.f32.partialorder %v45_v13, %v299_v1  ;;  %vm68_vm5 = vcmp.ge.f32.partialorder %v63_v12, %v299_v1 }
  0x8c   :  { %v52_v16 = vsel %vm50_vm4, 128.0, %v268_v14  ;;  %v70_v21 = vsel %vm68_vm5, 32.0, %v268_v14  ;;  %vm154_vm4 = vcmask 1041408   ;;  %vm149_vm5 = vcmp.eq.s32.totalorder %v133_v59, 15 }
  0x8d   :  { %v60_v17 = vadd.f32 %v58_v15, %v52_v16 }
  0x8e   :  { %v65_v18 = vpop.permute.xlu1 %64  ;;  %v47_v19 = vpop.permute.xlu0 %46 }
  0x8f   :  { %vm69_vm6 = vcmp.ge.f32.partialorder %v65_v18, %v297_v0  ;;  %vm51_vm7 = vcmp.ge.f32.partialorder %v47_v19, %v297_v0  ;;  %v72_v23 = vadd.f32 %v70_v21, %v60_v17 }
  0x90   :  { %v53_v22 = vsel %vm51_vm7, 128.0, %v268_v14  ;;  %v71_v25 = vsel %vm69_vm6, 32.0, %v268_v14  ;;  %vm165_vm6 = vcmp.eq.s32.totalorder %v164_v3, 0  ;;  %vm166_vm7 = vcmp.eq.s32.totalorder %v164_v3, 15 }
  0x91   :  { %v61_v24 = vadd.f32 %v59_v20, %v53_v22  ;;  %v84_v33 = vadd.f32 %v82_v30, %v72_v23 }
  0x92   :  { %v89_v26 = vpop.permute.xlu1 %88  ;;  %v87_v27 = vpop.permute.xlu0 %86 }
  0x93   :  { %v73_v28 = vadd.f32 %v71_v25, %v61_v24  ;;  %vm93_vm10 = vcmp.ge.f32.partialorder %v89_v26, %v297_v0  ;;  %vm92_vm11 = vcmp.ge.f32.partialorder %v87_v27, %v299_v1 }
  0x94   :  { %v94_v31 = vsel %vm92_vm11, 8.0, %v268_v14  ;;  %v95_v34 = vsel %vm93_vm10, 8.0, %v268_v14 }
  0x95   :  { %v85_v32 = vadd.f32 %v83_v29, %v73_v28  ;;  %v96_v38 = vadd.f32 %v94_v31, %v84_v33 }
  0x96   :  { %v102_v35 = vpop.permute.xlu1 %101  ;;  %v100_v36 = vpop.permute.xlu0 %99 }
  0x97   :  { %v97_v37 = vadd.f32 %v95_v34, %v85_v32  ;;  %vm106_vm14 = vcmp.ge.f32.partialorder %v102_v35, %v297_v0  ;;  %vm105_vm15 = vcmp.ge.f32.partialorder %v100_v36, %v299_v1 }
  0x98   :  { %v108_v41 = vsel %vm106_vm14, 4.0, %v268_v14  ;;  %v107_v42 = vsel %vm105_vm15, 4.0, %v268_v14 }
  0x99   :  { %v110_v43 = vadd.f32 %v108_v41, %v97_v37  ;;  %v109_v44 = vadd.f32 %v107_v42, %v96_v38 }
  0x9a   :  { %v120_v46 = vpop.permute.xlu1 %119  ;;  %v118_v47 = vpop.permute.xlu0 %117 }
  0x9b   :  { %v116_v48 = vadd.f32 %v114_v39, %v110_v43  ;;  %vm124_vm0 = vcmp.ge.f32.partialorder %v120_v46, %v297_v0  ;;  %v115_v49 = vadd.f32 %v113_v40, %v109_v44  ;;  %vm123_vm1 = vcmp.ge.f32.partialorder %v118_v47, %v299_v1 }
  0x9c   :  { %v126_v50 = vsel %vm124_vm0, 1.0, %v268_v14  ;;  %v125_v51 = vsel %vm123_vm1, 1.0, %v268_v14 }
  0x9d   :  { %v128_v52 = vadd.f32 %v126_v50, %v116_v48  ;;  %v127_v53 = vadd.f32 %v125_v51, %v115_v49 }
  0x9f   :  { %v130_v55 = vmul.f32 0.003921569, %v128_v52  ;;  %v129_v56 = vmul.f32 0.003921569, %v127_v53 }
  0xa1   :  { %v140_v57 = vrot.slane %v130_v55, 2  ;;  %v139_v58 = vrot.slane %v129_v56, 2  ;;  %v151_v62 = vrot.slane %v130_v55, 6 }
  0xa3   :  { %v141_v60 = vsel %vm138_vm2, %v139_v58, %v140_v57 }
  0xa4   :  { %v146_v61 = vsel %vm134_vm3, %v141_v60, %v129_v56 }
  0xa5   :  { %169 = vrot.lane.b32.xlu0 %v146_v61, %s269_s0  ;;  %v155_v63 = vrot.slane %v146_v61, 6 }
  0xa7   :  { %v156_v0 = vsel %vm154_vm4, %v155_v63, %v151_v62 }
  0xa8   :  { %v161_v1 = vsel %vm149_vm5, %v156_v0, %v130_v55 }
  0xa9   :  { %171 = vrot.lane.b32.xlu1 %v161_v1, %s269_s0 }
 0x117   :  { %v170_v4 = vpop.permute.xlu0 %169 }
 0x118   :  { %v175_v5 = vsel %vm165_vm6, %v170_v4, %v146_v61 }
 0x119   :  { %179 = vrot.lane.b32.xlu0 %v175_v5, %s270_s22 }
 0x11b   :  { %v172_v6 = vpop.permute.xlu1 %171 }
 0x11c   :  { %v176_v7 = vsel %vm165_vm6, %v172_v6, %v161_v1 }
 0x11d   :  { %181 = vrot.lane.b32.xlu1 %v176_v7, %s270_s22 }
 0x18b   :  { %v180_v8 = vpop.permute.xlu0 %179 }
 0x18c   :  { %v185_v9 = vsel %vm166_vm7, %v180_v8, %v175_v5 }
 0x18d   :  { %187 = vst [vmem:[#allocation5] sm:$0xff] %v185_v9 }
 0x18f   :  { %v182_v10 = vpop.permute.xlu1 %181 }
 0x190   :  { %v186_v11 = vsel %vm166_vm7, %v182_v10, %v176_v7 }
 0x191   :  { %188 = vst [vmem:[#allocation5 + $0x8] sm:$0xff] %v186_v11 }
 0x192   :  { %248 = shalt.err (!%p245_p12)
}
 0x193   :  { %s249_s28 = scalar_lea.hbm %s341_s1, 256 }
 0x194   :  { %p250_p13 = scmp.ne.s32.totalorder %s341_s1, %s249_s28  ;;  %p253_p0 = scmp.lt.u32.totalorder %s249_s28, %s341_s1 }
 0x196   :  { %p255_p1 = pnand %p253_p0, %p250_p13 }
 0x198   :  { %258 = shalt.err (!%p255_p1)
}
 0x199   :  { %200 = dma.vmem_to_hbm [thread:$0]  %s195_s24, 256, %s341_s1, [#allocation4], %s264_s16, %s264_s16, %s265_s17  }
 0x19a   :  { %261 = dma.done.wait [#allocation4], 256  }
 0x19b   :  { %262 = vsyncadd [#allocation4], 4294967040 }
 0x19c   :  { %204 = vsyncpa [#allocation3], 1 }
 0x19d   :  { %205 = vsyncpa [#allocation4], 1 }

</bundles_post_ra>
